<compile_context>
chip_gen: v7x
topology: tpu7x:2x2x1
jax: 0.10.0
libtpu: 0.0.40
codegen_flags: <defaults>
</compile_context>

<pallas_src>
import functools

import jax
import jax.numpy as jnp
import numpy as np
from jax import lax
from jax.experimental import pallas as pl
from jax.experimental.pallas import tpu as pltpu


def mylstm_kernel(gx_ref, gnoise_ref, w_r_ref, w_n_ref, b_row_ref, out_ref, *, H, NC):
    """Whole-sequence LSTM recurrence in one grid-less invocation.

    gx_ref     : (T, Bp, 4H)      f32   precomputed x @ W_ih^T + b_ih + b_hh
    gnoise_ref : (T, Bp, 128)     f32   lanes 0:2 hold gumbel noise + b_use
    w_r_ref    : (H, 4H+AUX)      bf16  [W_hh | W_use | W_pred | W_util]
    w_n_ref    : (2H, AUX+NC)     bf16  blockdiag heads applied to [h_new | c_new]
    b_row_ref  : (1, 128)         f32   [b_pred | b_predc | b_util | 0...]
    out_ref    : (T, Bp, 128)     f32   [pred(NC) | cell(NC) | util(1) | 0...]
    """
    T, Bp, _ = gx_ref.shape
    AUX = 2 + NC + 1                          # [use(2) | pred(NC) | util(1)]
    OUTW = out_ref.shape[-1]

    # Resident weights/biases: read once, streamed from VMEM by the MXU every step.
    w_r = w_r_ref[...]
    w_n = w_n_ref[...]
    b_row = b_row_ref[...]
    pad = jnp.zeros((Bp, OUTW - (2 * NC + 1)), jnp.float32)   # hoisted out of the loop

    def lstm_cell(gates, c_prev):
        # torch.nn.LSTMCell gate order: i, f, g, o
        i_g = jax.nn.sigmoid(gates[:, 0 * H:1 * H])
        f_g = jax.nn.sigmoid(gates[:, 1 * H:2 * H])
        g_g = jnp.tanh(gates[:, 2 * H:3 * H])
        o_g = jax.nn.sigmoid(gates[:, 3 * H:4 * H])
        c_new = f_g * c_prev + i_g * g_g
        h_new = o_g * jnp.tanh(c_new)
        return h_new, c_new

    def new_heads(h_new, c_new):
        # One fused matmul: [h_new | c_new] @ blockdiag([W_use|W_pred|W_util], W_predc)
        hc = jnp.concatenate([h_new, c_new], axis=-1).astype(w_n.dtype)
        return jnp.dot(hc, w_n, preferred_element_type=jnp.float32)   # (Bp, AUX+NC)

    def emit(t, pred_util, cell_head):
        # Lane-dense (Bp, 128) row into the VMEM-resident output slab (single HBM writeback).
        row = jnp.concatenate(
            [pred_util[:, :NC], cell_head, pred_util[:, NC:NC + 1], pad], axis=-1) + b_row
        out_ref[t] = row

    # ---- step 0: LSTMCell with zero initial state, no gumbel mixing ----
    h0, c0 = lstm_cell(gx_ref[0], jnp.zeros((Bp, H), jnp.float32))
    n0 = new_heads(h0, c0)
    emit(0, n0[:, 2:AUX], n0[:, AUX:AUX + NC])

    # ---- steps 1..T-1: recurrence carried in vregs by fori_loop ----
    def body(t, carry):
        h_prev, c_prev = carry

        # Single fused recurrent matmul: W_hh gates + h_prev projections for use/pred/util.
        r = jnp.dot(h_prev.astype(w_r.dtype), w_r,
                    preferred_element_type=jnp.float32)               # (Bp, 4H+AUX)
        gates = gx_ref[t] + r[:, :4 * H]
        h_new, c_new = lstm_cell(gates, c_prev)
        n = new_heads(h_new, c_new)

        # F.gumbel_softmax(fc_use(h_new - h_prev), tau=1, hard=False).
        # A 2-way softmax is exactly sigmoid of the logit difference (single EUP op).
        g = gnoise_ref[t]                                             # lanes 0:2 = gumbel + b_use
        z0 = n[:, 0:1] - r[:, 4 * H:4 * H + 1] + g[:, 0:1]
        z1 = n[:, 1:2] - r[:, 4 * H + 1:4 * H + 2] + g[:, 1:2]
        u1 = jax.nn.sigmoid(z1 - z0)
        u0 = 1.0 - u1

        # h = bmm(stack([h_prev, h_new], -1), use[..., None]) = u0*h_prev + u1*h_new
        h_out = u0 * h_prev + u1 * h_new
        # fc_pred / fc_utility on the mixed h via linearity (u0 + u1 == 1): no extra matmul.
        pred_util = u0 * r[:, 4 * H + 2:4 * H + AUX] + u1 * n[:, 2:AUX]
        emit(t, pred_util, n[:, AUX:AUX + NC])

        # TODO(synk): the module also computes watch.append(torch.argmax(use)) but never
        # returns it, so it is intentionally not materialized here.
        return h_out, c_new

    lax.fori_loop(1, T, body, (h0, c0))


def my_lstm_forward(feature, gumbel, params):
    """feature: (B, T, Din) f32;  gumbel: (T, B, 2) Gumbel(0,1) noise;  params: PyTorch layout.

    Returns (hidden, cell, utility) stacked over time: (T,B,NC), (T,B,NC), (T,B,1)
    (the PyTorch module returns Python lists of per-frame tensors)."""
    B, T, Din = feature.shape
    H = params["w_hh"].shape[1]
    NC = params["w_pred"].shape[0]
    AUX = 2 + NC + 1
    OUTW = 128                                  # lane-dense output slab width
    Bp = -(-B // 8) * 8                         # pad batch to a sublane multiple
    f32, bf16 = jnp.float32, jnp.bfloat16

    # (1) Hoisted input projection: one dense batched matmul (plain XLA) with the bias folded in.
    #     W_ih therefore never needs to be VMEM-resident inside the recurrence.
    x = jnp.pad(jnp.transpose(feature, (1, 0, 2)), ((0, 0), (0, Bp - B), (0, 0)))
    gates_x = (jnp.einsum("tbd,gd->tbg", x, params["w_ih"])
               + (params["b_ih"] + params["b_hh"]))                    # (T, Bp, 4H) f32

    # (2) Fused, bf16 resident weights (f32 accumulation on the MXU).
    w_hh_t, w_use_t = params["w_hh"].T, params["w_use"].T
    w_pred_t, w_predc_t, w_util_t = params["w_pred"].T, params["w_predc"].T, params["w_util"].T
    w_r = jnp.concatenate([w_hh_t, w_use_t, w_pred_t, w_util_t], axis=1).astype(bf16)
    w_n = jnp.concatenate(
        [jnp.concatenate([w_use_t, w_pred_t, w_util_t, jnp.zeros((H, NC), f32)], axis=1),
         jnp.concatenate([jnp.zeros((H, AUX), f32), w_predc_t], axis=1)],
        axis=0).astype(bf16)                                           # (2H, AUX+NC)

    # (3) Gumbel noise with b_use folded in, padded to a full 128-lane slab (slot t=0 unused).
    gnoise = jnp.zeros((T, Bp, 128), f32).at[:, :B, :2].set(gumbel + params["b_use"])

    # (4) Output-head biases as one lane-dense row: [b_pred | b_predc | b_util | 0...].
    b_row = jnp.zeros((1, OUTW), f32).at[0, :2 * NC + 1].set(
        jnp.concatenate([params["b_pred"], params["b_predc"], params["b_util"]]))

    # Grid-less call: whole arrays live in VMEM, no per-step pipeline overhead and no
    # double-buffering of the invariant weights.
    vmem = pl.BlockSpec(memory_space=pltpu.MemorySpace.VMEM)
    out = pl.pallas_call(
        functools.partial(mylstm_kernel, H=H, NC=NC),
        out_shape=jax.ShapeDtypeStruct((T, Bp, OUTW), f32),
        in_specs=[vmem] * 5,
        out_specs=vmem,
        compiler_params=pltpu.CompilerParams(
            # Toy shapes need <1 MiB; at full scale (H=2048, T=96) raise toward ~56 MiB
            # (bf16 W_R ~32 MiB + f32 gates_x ~25 MiB) while staying under v7x's 64 MiB.
            vmem_limit_bytes=32 * 1024 * 1024),
    )(gates_x, gnoise, w_r, w_n, b_row)

    # TODO(synk): if several independent sequences are available, batch them (and add a
    # "parallel" grid axis over batch chunks) to use v7x's second TensorCore; a single
    # sequential recurrence offers no parallel axis.
    hidden = out[:, :B, 0:NC]
    cell = out[:, :B, NC:2 * NC]
    utility = out[:, :B, 2 * NC:2 * NC + 1]
    return hidden, cell, utility


# ----------------------------- pure-JAX f32 reference ---------------------------------
def reference_forward(feature, gumbel, p):
    x = jnp.transpose(feature, (1, 0, 2))
    T, B, _ = x.shape
    H = p["w_hh"].shape[1]
    h = jnp.zeros((B, H), jnp.float32)
    c = jnp.zeros((B, H), jnp.float32)
    hid, cel, uti = [], [], []
    for i in range(T):
        gates = x[i] @ p["w_ih"].T + p["b_ih"] + h @ p["w_hh"].T + p["b_hh"]
        i_g = jax.nn.sigmoid(gates[:, 0 * H:1 * H])
        f_g = jax.nn.sigmoid(gates[:, 1 * H:2 * H])
        g_g = jnp.tanh(gates[:, 2 * H:3 * H])
        o_g = jax.nn.sigmoid(gates[:, 3 * H:4 * H])
        c_new = f_g * c + i_g * g_g
        h_new = o_g * jnp.tanh(c_new)
        if i == 0:
            h_out = h_new
        else:
            logits = (h_new - h) @ p["w_use"].T + p["b_use"]
            use = jax.nn.softmax(logits + gumbel[i], axis=-1)
            h_out = h * use[:, 0:1] + h_new * use[:, 1:2]
        h, c = h_out, c_new
        hid.append(h_out @ p["w_pred"].T + p["b_pred"])
        cel.append(c_new @ p["w_predc"].T + p["b_predc"])
        uti.append(h_out @ p["w_util"].T + p["b_util"])
    return jnp.stack(hid), jnp.stack(cel), jnp.stack(uti)


# ------------------------------------- main --------------------------------------------
if __name__ == "__main__":
    # Small shapes consistent with the module (feature_len scaled 2048 -> 128,
    # num_frame 96 -> 8, position_mode='cat' => inshape = 2 * feature_len).
    B, T, H, NC = 2, 8, 128, 2
    Din = 2 * H

    key = jax.random.PRNGKey(0)
    ks = jax.random.split(key, 14)
    scale = 1.0 / np.sqrt(H)

    def u(k, shape):
        return jax.random.uniform(k, shape, jnp.float32, -scale, scale)

    # PyTorch-layout parameters.
    params = {
        "w_ih": u(ks[0], (4 * H, Din)),   # nn.LSTMCell.weight_ih
        "w_hh": u(ks[1], (4 * H, H)),     # nn.LSTMCell.weight_hh
        "b_ih": u(ks[2], (4 * H,)),
        "b_hh": u(ks[3], (4 * H,)),
        "w_use": u(ks[4], (2, H)),        # fc_use
        "b_use": u(ks[5], (2,)),
        "w_pred": u(ks[6], (NC, H)),      # fc_pred
        "b_pred": u(ks[7], (NC,)),
        "w_predc": u(ks[8], (NC, H)),     # fc_pred_c
        "b_predc": u(ks[9], (NC,)),
        "w_util": u(ks[10], (1, H)),      # fc_utility
        "b_util": u(ks[11], (1,)),
    }

    feature = jax.random.normal(ks[12], (B, T, Din), jnp.float32)

    # Gumbel noise for F.gumbel_softmax (tau=1, hard=False); slot t=0 is unused.
    unif = jax.random.uniform(ks[13], (T, B, 2), jnp.float32, 1e-6, 1.0 - 1e-6)
    gumbel = -jnp.log(-jnp.log(unif))

    hidden, cell, utility = jax.block_until_ready(
        my_lstm_forward(feature, gumbel, params))

    rh, rc, ru = reference_forward(feature, gumbel, params)
    # Tolerance accounts for bf16-resident weights / bf16 MXU inputs (f32 accumulation)
    # vs. the pure-f32 reference.
    np.testing.assert_allclose(np.asarray(hidden), np.asarray(rh), rtol=2e-2, atol=2e-2)
    np.testing.assert_allclose(np.asarray(cell), np.asarray(rc), rtol=2e-2, atol=2e-2)
    np.testing.assert_allclose(np.asarray(utility), np.asarray(ru), rtol=2e-2, atol=2e-2)

    assert hidden.shape == (T, B, NC) and cell.shape == (T, B, NC) and utility.shape == (T, B, 1)
    print("KERNEL_OK")
</pallas_src>

<mosaic_0001>
module attributes {stable_mosaic.version = 11 : i64} {
  func.func @mylstm_kernel(%arg0: memref<8x8x512xf32, #tpu.memory_space<vmem>>, %arg1: memref<8x8x128xf32, #tpu.memory_space<vmem>>, %arg2: memref<128x517xbf16, #tpu.memory_space<vmem>>, %arg3: memref<256x7xbf16, #tpu.memory_space<vmem>>, %arg4: memref<1x128xf32, #tpu.memory_space<vmem>>, %arg5: memref<8x8x128xf32, #tpu.memory_space<vmem>>) attributes {dimension_semantics = [], scalar_prefetch = 0 : i64, scratch_operands = 0 : i64, tpu.core_type = #tpu.core_type<tc>} {
    %c0 = arith.constant 0 : index
    %c0_0 = arith.constant 0 : index
    %0 = vector.load %arg2[%c0, %c0_0] : memref<128x517xbf16, #tpu.memory_space<vmem>>, vector<128x517xbf16>
    %c0_1 = arith.constant 0 : index
    %c0_2 = arith.constant 0 : index
    %1 = vector.load %arg3[%c0_1, %c0_2] : memref<256x7xbf16, #tpu.memory_space<vmem>>, vector<256x7xbf16>
    %c0_3 = arith.constant 0 : index
    %c0_4 = arith.constant 0 : index
    %2 = vector.load %arg4[%c0_3, %c0_4] : memref<1x128xf32, #tpu.memory_space<vmem>>, vector<1x128xf32>
    %cst = arith.constant 0.000000e+00 : f32
    %3 = vector.broadcast %cst : f32 to vector<8x123xf32>
    %c0_5 = arith.constant 0 : index
    %c0_6 = arith.constant 0 : index
    %c0_7 = arith.constant 0 : index
    %4 = vector.load %arg0[%c0_5, %c0_6, %c0_7] : memref<8x8x512xf32, #tpu.memory_space<vmem>>, vector<1x8x512xf32>
    %5 = vector.shape_cast %4 : vector<1x8x512xf32> to vector<8x512xf32>
    %cst_8 = arith.constant 0.000000e+00 : f32
    %6 = vector.broadcast %cst_8 : f32 to vector<8x128xf32>
    %7 = vector.extract_strided_slice %5 {offsets = [0, 0], sizes = [8, 128], strides = [1, 1]} : vector<8x512xf32> to vector<8x128xf32>
    %8 = arith.negf %7 : vector<8x128xf32>
    %9 = math.exp %8 : vector<8x128xf32>
    %cst_9 = arith.constant 1.000000e+00 : f32
    %10 = vector.broadcast %cst_9 : f32 to vector<8x128xf32>
    %11 = arith.addf %10, %9 : vector<8x128xf32>
    %12 = arith.divf %10, %11 : vector<8x128xf32>
    %13 = vector.extract_strided_slice %5 {offsets = [0, 128], sizes = [8, 128], strides = [1, 1]} : vector<8x512xf32> to vector<8x128xf32>
    %14 = arith.negf %13 : vector<8x128xf32>
    %15 = math.exp %14 : vector<8x128xf32>
    %cst_10 = arith.constant 1.000000e+00 : f32
    %16 = vector.broadcast %cst_10 : f32 to vector<8x128xf32>
    %17 = arith.addf %16, %15 : vector<8x128xf32>
    %18 = arith.divf %16, %17 : vector<8x128xf32>
    %19 = vector.extract_strided_slice %5 {offsets = [0, 256], sizes = [8, 128], strides = [1, 1]} : vector<8x512xf32> to vector<8x128xf32>
    %20 = math.tanh %19 : vector<8x128xf32>
    %21 = vector.extract_strided_slice %5 {offsets = [0, 384], sizes = [8, 128], strides = [1, 1]} : vector<8x512xf32> to vector<8x128xf32>
    %22 = arith.negf %21 : vector<8x128xf32>
    %23 = math.exp %22 : vector<8x128xf32>
    %cst_11 = arith.constant 1.000000e+00 : f32
    %24 = vector.broadcast %cst_11 : f32 to vector<8x128xf32>
    %25 = arith.addf %24, %23 : vector<8x128xf32>
    %26 = arith.divf %24, %25 : vector<8x128xf32>
    %27 = arith.mulf %18, %6 : vector<8x128xf32>
    %28 = arith.mulf %12, %20 : vector<8x128xf32>
    %29 = arith.addf %27, %28 : vector<8x128xf32>
    %30 = math.tanh %29 : vector<8x128xf32>
    %31 = arith.mulf %26, %30 : vector<8x128xf32>
    %32 = tpu.concatenate %31, %29 in 1 : vector<8x128xf32>, vector<8x128xf32> -> vector<8x256xf32>
    %33 = arith.truncf %32 : vector<8x256xf32> to vector<8x256xbf16>
    %cst_12 = arith.constant dense<0.000000e+00> : vector<8x7xf32>
    %34 = tpu.matmul %33, %1, %cst_12 {dimension_numbers = #tpu.dot_dimension_numbers<[1], [0], [0], [1], [0, 0, 1, 1], [], []>} : vector<8x256xbf16>, vector<256x7xbf16>, vector<8x7xf32> -> vector<8x7xf32>
    %35 = vector.extract_strided_slice %34 {offsets = [0, 2], sizes = [8, 3], strides = [1, 1]} : vector<8x7xf32> to vector<8x3xf32>
    %36 = vector.extract_strided_slice %34 {offsets = [0, 5], sizes = [8, 2], strides = [1, 1]} : vector<8x7xf32> to vector<8x2xf32>
    %37 = vector.extract_strided_slice %35 {offsets = [0, 0], sizes = [8, 2], strides = [1, 1]} : vector<8x3xf32> to vector<8x2xf32>
    %38 = vector.extract_strided_slice %35 {offsets = [0, 2], sizes = [8, 1], strides = [1, 1]} : vector<8x3xf32> to vector<8x1xf32>
    %39 = tpu.concatenate %37, %36, %38, %3 in 1 : vector<8x2xf32>, vector<8x2xf32>, vector<8x1xf32>, vector<8x123xf32> -> vector<8x128xf32>
    %40 = vector.broadcast %2 : vector<1x128xf32> to vector<8x128xf32>
    %41 = arith.addf %39, %40 : vector<8x128xf32>
    %c0_13 = arith.constant 0 : index
    %c0_14 = arith.constant 0 : index
    %c0_15 = arith.constant 0 : index
    %42 = vector.load %arg5[%c0_13, %c0_14, %c0_15] : memref<8x8x128xf32, #tpu.memory_space<vmem>>, vector<1x8x128xf32>
    %43 = vector.shape_cast %42 : vector<1x8x128xf32> to vector<8x128xf32>
    %44 = vector.shape_cast %41 : vector<8x128xf32> to vector<1x8x128xf32>
    tpu.vector_store %arg5[%c0_13, %c0_14, %c0_15], %44 {strides = array<i32>} : memref<8x8x128xf32, #tpu.memory_space<vmem>>, vector<1x8x128xf32>,
    %c1_i32 = arith.constant 1 : i32
    %c7_i32 = arith.constant 7 : i32
    %45 = arith.addi %c1_i32, %c7_i32 : i32
    %c1_i32_16 = arith.constant 1 : i32
    %46:2 = scf.for %arg6 = %c1_i32 to %45 step %c1_i32_16 iter_args(%arg7 = %31, %arg8 = %29) -> (vector<8x128xf32>, vector<8x128xf32>)  : i32 {
      %47 = arith.truncf %arg7 : vector<8x128xf32> to vector<8x128xbf16>
      %cst_18 = arith.constant dense<0.000000e+00> : vector<8x517xf32>
      %48 = tpu.matmul %47, %0, %cst_18 {dimension_numbers = #tpu.dot_dimension_numbers<[1], [0], [0], [1], [0, 0, 1, 1], [], []>} : vector<8x128xbf16>, vector<128x517xbf16>, vector<8x517xf32> -> vector<8x517xf32>
      %49 = arith.index_cast %arg6 : i32 to index
      %c0_19 = arith.constant 0 : index
      %c0_20 = arith.constant 0 : index
      %50 = vector.load %arg0[%49, %c0_19, %c0_20] : memref<8x8x512xf32, #tpu.memory_space<vmem>>, vector<1x8x512xf32>
      %51 = vector.shape_cast %50 : vector<1x8x512xf32> to vector<8x512xf32>
      %52 = vector.extract_strided_slice %48 {offsets = [0, 0], sizes = [8, 512], strides = [1, 1]} : vector<8x517xf32> to vector<8x512xf32>
      %53 = arith.addf %51, %52 : vector<8x512xf32>
      %54 = vector.extract_strided_slice %53 {offsets = [0, 0], sizes = [8, 128], strides = [1, 1]} : vector<8x512xf32> to vector<8x128xf32>
      %55 = arith.negf %54 : vector<8x128xf32>
      %56 = math.exp %55 : vector<8x128xf32>
      %cst_21 = arith.constant 1.000000e+00 : f32
      %57 = vector.broadcast %cst_21 : f32 to vector<8x128xf32>
      %58 = arith.addf %57, %56 : vector<8x128xf32>
      %59 = arith.divf %57, %58 : vector<8x128xf32>
      %60 = vector.extract_strided_slice %53 {offsets = [0, 128], sizes = [8, 128], strides = [1, 1]} : vector<8x512xf32> to vector<8x128xf32>
      %61 = arith.negf %60 : vector<8x128xf32>
      %62 = math.exp %61 : vector<8x128xf32>
      %cst_22 = arith.constant 1.000000e+00 : f32
      %63 = vector.broadcast %cst_22 : f32 to vector<8x128xf32>
      %64 = arith.addf %63, %62 : vector<8x128xf32>
      %65 = arith.divf %63, %64 : vector<8x128xf32>
      %66 = vector.extract_strided_slice %53 {offsets = [0, 256], sizes = [8, 128], strides = [1, 1]} : vector<8x512xf32> to vector<8x128xf32>
      %67 = math.tanh %66 : vector<8x128xf32>
      %68 = vector.extract_strided_slice %53 {offsets = [0, 384], sizes = [8, 128], strides = [1, 1]} : vector<8x512xf32> to vector<8x128xf32>
      %69 = arith.negf %68 : vector<8x128xf32>
      %70 = math.exp %69 : vector<8x128xf32>
      %cst_23 = arith.constant 1.000000e+00 : f32
      %71 = vector.broadcast %cst_23 : f32 to vector<8x128xf32>
      %72 = arith.addf %71, %70 : vector<8x128xf32>
      %73 = arith.divf %71, %72 : vector<8x128xf32>
      %74 = arith.mulf %65, %arg8 : vector<8x128xf32>
      %75 = arith.mulf %59, %67 : vector<8x128xf32>
      %76 = arith.addf %74, %75 : vector<8x128xf32>
      %77 = math.tanh %76 : vector<8x128xf32>
      %78 = arith.mulf %73, %77 : vector<8x128xf32>
      %79 = tpu.concatenate %78, %76 in 1 : vector<8x128xf32>, vector<8x128xf32> -> vector<8x256xf32>
      %80 = arith.truncf %79 : vector<8x256xf32> to vector<8x256xbf16>
      %cst_24 = arith.constant dense<0.000000e+00> : vector<8x7xf32>
      %81 = tpu.matmul %80, %1, %cst_24 {dimension_numbers = #tpu.dot_dimension_numbers<[1], [0], [0], [1], [0, 0, 1, 1], [], []>} : vector<8x256xbf16>, vector<256x7xbf16>, vector<8x7xf32> -> vector<8x7xf32>
      %82 = arith.index_cast %arg6 : i32 to index
      %c0_25 = arith.constant 0 : index
      %c0_26 = arith.constant 0 : index
      %83 = vector.load %arg1[%82, %c0_25, %c0_26] : memref<8x8x128xf32, #tpu.memory_space<vmem>>, vector<1x8x128xf32>
      %84 = vector.shape_cast %83 : vector<1x8x128xf32> to vector<8x128xf32>
      %85 = vector.extract_strided_slice %81 {offsets = [0, 0], sizes = [8, 1], strides = [1, 1]} : vector<8x7xf32> to vector<8x1xf32>
      %86 = vector.extract_strided_slice %48 {offsets = [0, 512], sizes = [8, 1], strides = [1, 1]} : vector<8x517xf32> to vector<8x1xf32>
      %87 = arith.subf %85, %86 : vector<8x1xf32>
      %88 = vector.extract_strided_slice %84 {offsets = [0, 0], sizes = [8, 1], strides = [1, 1]} : vector<8x128xf32> to vector<8x1xf32>
      %89 = arith.addf %87, %88 : vector<8x1xf32>
      %90 = vector.extract_strided_slice %81 {offsets = [0, 1], sizes = [8, 1], strides = [1, 1]} : vector<8x7xf32> to vector<8x1xf32>
      %91 = vector.extract_strided_slice %48 {offsets = [0, 513], sizes = [8, 1], strides = [1, 1]} : vector<8x517xf32> to vector<8x1xf32>
      %92 = arith.subf %90, %91 : vector<8x1xf32>
      %93 = vector.extract_strided_slice %84 {offsets = [0, 1], sizes = [8, 1], strides = [1, 1]} : vector<8x128xf32> to vector<8x1xf32>
      %94 = arith.addf %92, %93 : vector<8x1xf32>
      %95 = arith.subf %94, %89 : vector<8x1xf32>
      %96 = arith.negf %95 : vector<8x1xf32>
      %97 = math.exp %96 : vector<8x1xf32>
      %cst_27 = arith.constant 1.000000e+00 : f32
      %98 = vector.broadcast %cst_27 : f32 to vector<8x1xf32>
      %99 = arith.addf %98, %97 : vector<8x1xf32>
      %100 = arith.divf %98, %99 : vector<8x1xf32>
      %cst_28 = arith.constant 1.000000e+00 : f32
      %101 = vector.broadcast %cst_28 : f32 to vector<8x1xf32>
      %102 = arith.subf %101, %100 : vector<8x1xf32>
      %103 = vector.broadcast %102 : vector<8x1xf32> to vector<8x128xf32>
      %104 = arith.mulf %103, %arg7 : vector<8x128xf32>
      %105 = vector.broadcast %100 : vector<8x1xf32> to vector<8x128xf32>
      %106 = arith.mulf %105, %78 : vector<8x128xf32>
      %107 = arith.addf %104, %106 : vector<8x128xf32>
      %108 = vector.extract_strided_slice %48 {offsets = [0, 514], sizes = [8, 3], strides = [1, 1]} : vector<8x517xf32> to vector<8x3xf32>
      %109 = vector.broadcast %102 : vector<8x1xf32> to vector<8x3xf32>
      %110 = arith.mulf %109, %108 : vector<8x3xf32>
      %111 = vector.extract_strided_slice %81 {offsets = [0, 2], sizes = [8, 3], strides = [1, 1]} : vector<8x7xf32> to vector<8x3xf32>
      %112 = vector.broadcast %100 : vector<8x1xf32> to vector<8x3xf32>
      %113 = arith.mulf %112, %111 : vector<8x3xf32>
      %114 = arith.addf %110, %113 : vector<8x3xf32>
      %115 = vector.extract_strided_slice %81 {offsets = [0, 5], sizes = [8, 2], strides = [1, 1]} : vector<8x7xf32> to vector<8x2xf32>
      %116 = vector.extract_strided_slice %114 {offsets = [0, 0], sizes = [8, 2], strides = [1, 1]} : vector<8x3xf32> to vector<8x2xf32>
      %117 = vector.extract_strided_slice %114 {offsets = [0, 2], sizes = [8, 1], strides = [1, 1]} : vector<8x3xf32> to vector<8x1xf32>
      %118 = tpu.concatenate %116, %115, %117, %3 in 1 : vector<8x2xf32>, vector<8x2xf32>, vector<8x1xf32>, vector<8x123xf32> -> vector<8x128xf32>
      %119 = vector.broadcast %2 : vector<1x128xf32> to vector<8x128xf32>
      %120 = arith.addf %118, %119 : vector<8x128xf32>
      %121 = arith.index_cast %arg6 : i32 to index
      %c0_29 = arith.constant 0 : index
      %c0_30 = arith.constant 0 : index
      %122 = vector.load %arg5[%121, %c0_29, %c0_30] : memref<8x8x128xf32, #tpu.memory_space<vmem>>, vector<1x8x128xf32>
      %123 = vector.shape_cast %122 : vector<1x8x128xf32> to vector<8x128xf32>
      %124 = vector.shape_cast %120 : vector<8x128xf32> to vector<1x8x128xf32>
      tpu.vector_store %arg5[%121, %c0_29, %c0_30], %124 {strides = array<i32>} : memref<8x8x128xf32, #tpu.memory_space<vmem>>, vector<1x8x128xf32>,
      scf.yield %107, %76 : vector<8x128xf32>, vector<8x128xf32>
    }
    %c7_i32_17 = arith.constant 7 : i32
    return
  }
}

</mosaic_0001>

<bundles_post_ra>
// kernel: tpu_custom_call.1
= control target key start
LH: loop header
LB: loop body
LE: loop exit
PB: predicated region body
PF: predicated region fallthrough
CT: control target
= control target key end

     0   :  { %10 = vsyncpa [#allocation3], 0  ;;  %s1066_s27 = smov 125   ;;  %vm276_vm0 = vcmask 15360   ;;  %vm278_vm1 = vcmask 31744   ;;  %vm280_vm2 = vcmask 39936   ;;  %s1614_s0 = inlined_call_operand.vmem [shape: f32[8,8,512], index: 0, kind: input, shape index: {}]   ;;  %s1615_s1 = inlined_call_operand.vmem [shape: f32[8,8,128], index: 1, kind: input, shape index: {}]   ;;  %s1616_s2 = inlined_call_operand.vmem [shape: bf16[128,517], index: 2, kind: input, shape index: {}]   ;;  %s1617_s3 = inlined_call_operand.vmem [shape: bf16[256,7], index: 3, kind: input, shape index: {}]   ;;  %s1618_s4 = inlined_call_operand.vmem [shape: f32[1,128], index: 4, kind: input, shape index: {}]   ;;  %s1619_s5 = inlined_call_operand.hbm [shape: f32[8,8,128], index: 5, kind: output, shape index: {}]  }
   0x1   :  { %v1110_v0 = vld [vmem:[%s1616_s2] sm:$0xff]  ;;  %v1115_v1 = vld [vmem:[%s1616_s2 + $0x8] sm:$0xff]  ;;  %v1120_v2 = vld [vmem:[%s1616_s2 + $0x10] sm:$0xf]  ;;  %s1468_s30 = smov 1  }
   0x2   :  { %1627 = vst [vmem:[#allocation5_spill] sm:$0xff] %v1110_v0  ;;  %1628 = vst [vmem:[#allocation6_spill] sm:$0xff] %v1115_v1  ;;  %v1125_v3 = vld [vmem:[%s1616_s2 + $0x14] sm:$0xff]  ;;  %v1130_v4 = vld [vmem:[%s1616_s2 + $0x1c] sm:$0xff] }
   0x3   :  { %1629 = vst [vmem:[#allocation7_spill] sm:$0xff] %v1120_v2  ;;  %1630 = vst [vmem:[#allocation8_spill] sm:$0xff] %v1125_v3  ;;  %v1135_v5 = vld [vmem:[%s1616_s2 + $0x24] sm:$0xf]  ;;  %v1140_v6 = vld [vmem:[%s1616_s2 + $0x28] sm:$0xff] }
   0x4   :  { %1631 = vst [vmem:[#allocation9_spill] sm:$0xff] %v1130_v4  ;;  %1632 = vst [vmem:[#allocation10_spill] sm:$0xff] %v1135_v5  ;;  %v1145_v7 = vld [vmem:[%s1616_s2 + $0x30] sm:$0xff]  ;;  %v1150_v8 = vld [vmem:[%s1616_s2 + $0x38] sm:$0xf] }
   0x5   :  { %1633 = vst [vmem:[#allocation11_spill] sm:$0xff] %v1140_v6  ;;  %1634 = vst [vmem:[#allocation12_spill] sm:$0xff] %v1150_v8  ;;  %v1155_v9 = vld [vmem:[%s1616_s2 + $0x3c] sm:$0xff]  ;;  %v1160_v10 = vld [vmem:[%s1616_s2 + $0x44] sm:$0xff] }
   0x6   :  { %v1165_v11 = vld [vmem:[%s1616_s2 + $0x4c] sm:$0xf]  ;;  %v1170_v12 = vld [vmem:[%s1616_s2 + $0x50] sm:$0xff]  ;;  %v1175_v13 = vld [vmem:[%s1616_s2 + $0x58] sm:$0xff] }
   0x7   :  { %1635 = vst [vmem:[#allocation13_spill] sm:$0xff] %v1165_v11  ;;  %v1180_v14 = vld [vmem:[%s1616_s2 + $0x60] sm:$0xf]  ;;  %v1185_v15 = vld [vmem:[%s1616_s2 + $0x64] sm:$0xff]  ;;  %v1190_v16 = vld [vmem:[%s1616_s2 + $0x6c] sm:$0xff] }
   0x8   :  { %1636 = vst [vmem:[#allocation14_spill] sm:$0xff] %v1180_v14  ;;  %v1195_v17 = vld [vmem:[%s1616_s2 + $0x74] sm:$0xf]  ;;  %v1200_v18 = vld [vmem:[%s1616_s2 + $0x78] sm:$0xff]  ;;  %v1205_v19 = vld [vmem:[%s1616_s2 + $0x80] sm:$0xff] }
   0x9   :  { %1637 = vst [vmem:[#allocation15_spill] sm:$0xff] %v1195_v17  ;;  %v1210_v20 = vld [vmem:[%s1616_s2 + $0x88] sm:$0xf]  ;;  %v1215_v21 = vld [vmem:[%s1616_s2 + $0x8c] sm:$0xff]  ;;  %v1220_v22 = vld [vmem:[%s1616_s2 + $0x94] sm:$0xff] }
   0xa   :  { %1638 = vst [vmem:[#allocation16_spill] sm:$0xff] %v1210_v20  ;;  %v1225_v23 = vld [vmem:[%s1616_s2 + $0x9c] sm:$0xf]  ;;  %v1230_v24 = vld [vmem:[%s1616_s2 + $0xa0] sm:$0xff]  ;;  %v1235_v25 = vld [vmem:[%s1616_s2 + $0xa8] sm:$0xff] }
   0xb   :  { %1639 = vst [vmem:[#allocation17_spill] sm:$0xff] %v1225_v23  ;;  %v1240_v26 = vld [vmem:[%s1616_s2 + $0xb0] sm:$0xf]  ;;  %v1245_v27 = vld [vmem:[%s1616_s2 + $0xb4] sm:$0xff]  ;;  %v1250_v28 = vld [vmem:[%s1616_s2 + $0xbc] sm:$0xff] }
   0xc   :  { %1640 = vst [vmem:[#allocation18_spill] sm:$0xff] %v1240_v26  ;;  %v1255_v29 = vld [vmem:[%s1616_s2 + $0xc4] sm:$0xf]  ;;  %v1260_v30 = vld [vmem:[%s1616_s2 + $0xc8] sm:$0xff]  ;;  %v1265_v31 = vld [vmem:[%s1616_s2 + $0xd0] sm:$0xff] }
   0xd   :  { %1641 = vst [vmem:[#allocation19_spill] sm:$0xff] %v1255_v29  ;;  %v1270_v32 = vld [vmem:[%s1616_s2 + $0xd8] sm:$0xf]  ;;  %v1275_v33 = vld [vmem:[%s1616_s2 + $0xdc] sm:$0xff]  ;;  %v1280_v34 = vld [vmem:[%s1616_s2 + $0xe4] sm:$0xff] }
   0xe   :  { %1642 = vst [vmem:[#allocation20_spill] sm:$0xff] %v1270_v32  ;;  %v1285_v35 = vld [vmem:[%s1616_s2 + $0xec] sm:$0xf]  ;;  %v1290_v36 = vld [vmem:[%s1616_s2 + $0xf0] sm:$0xff]  ;;  %v1295_v37 = vld [vmem:[%s1616_s2 + $0xf8] sm:$0xff] }
   0xf   :  { %1643 = vst [vmem:[#allocation21_spill] sm:$0xff] %v1285_v35  ;;  %v1300_v38 = vld [vmem:[%s1616_s2 + $0x100] sm:$0xf]  ;;  %v1305_v39 = vld [vmem:[%s1616_s2 + $0x104] sm:$0xff]  ;;  %v1310_v40 = vld [vmem:[%s1616_s2 + $0x10c] sm:$0xff] }
  0x10   :  { %1644 = vst [vmem:[#allocation22_spill] sm:$0xff] %v1300_v38  ;;  %v1315_v41 = vld [vmem:[%s1616_s2 + $0x114] sm:$0xf]  ;;  %v1320_v42 = vld [vmem:[%s1616_s2 + $0x118] sm:$0xff]  ;;  %v1325_v43 = vld [vmem:[%s1616_s2 + $0x120] sm:$0xff] }
  0x11   :  { %1645 = vst [vmem:[#allocation23_spill] sm:$0xff] %v1315_v41  ;;  %v1330_v44 = vld [vmem:[%s1616_s2 + $0x128] sm:$0xf]  ;;  %v1335_v45 = vld [vmem:[%s1616_s2 + $0x12c] sm:$0xff]  ;;  %v1340_v46 = vld [vmem:[%s1616_s2 + $0x134] sm:$0xff] }
  0x12   :  { %1646 = vst [vmem:[#allocation24_spill] sm:$0xff] %v1330_v44  ;;  %v1345_v47 = vld [vmem:[%s1616_s2 + $0x13c] sm:$0xf]  ;;  %v1350_v48 = vld [vmem:[%s1617_s3 + $0x40] sm:$0xff]   ;;  %v1361_v50 = vld [vmem:[%s1617_s3 + $0x48] sm:$0xff]  }
  0x13   :  { %1647 = vst [vmem:[#allocation25_spill] sm:$0xff] %v1345_v47  ;;  %v1355_v49 = vld [vmem:[%s1617_s3] sm:$0xff]   ;;  %854 = vmatprep.subr.bf16.mxu0 %v1350_v48  ;;  %v1367_v51 = vld [vmem:[%s1617_s3 + $0x8] sm:$0xff]   ;;  %v1373_v52 = vld [vmem:[%s1617_s3 + $0x50] sm:$0xff]  }
  0x14   :  { %855 = vmatpush3.bf16.msra.mxu0 %v1355_v49  ;;  %v1379_v53 = vld [vmem:[%s1617_s3 + $0x10] sm:$0xff]   ;;  %v1385_v54 = vld [vmem:[%s1617_s3 + $0x58] sm:$0xff]   ;;  %v1397_v56 = vld [vmem:[%s1617_s3 + $0x60] sm:$0xff]  }
  0x15   :  { %856 = vmatprep.subr.bf16.mxu0 %v1361_v50  ;;  %v1391_v55 = vld [vmem:[%s1617_s3 + $0x18] sm:$0xff]   ;;  %v1403_v57 = vld [vmem:[%s1617_s3 + $0x20] sm:$0xff]   ;;  %v104_v59 = vld [vmem:[%s1614_s0 + $0x8] sm:$0xff] }
  0x16   :  { %v103_v58 = vld [vmem:[%s1614_s0] sm:$0xff]  ;;  %v1415_v60 = vld [vmem:[%s1617_s3 + $0x68] sm:$0xff]   ;;  %v787_v62 = vmul.f32 -1.442695, %v104_v59  ;;  %v1427_v44 = vld [vmem:[%s1617_s3 + $0x70] sm:$0xff]  }
  0x17   :  { %v786_v61 = vmul.f32 -1.442695, %v103_v58  ;;  %v1421_v63 = vld [vmem:[%s1617_s3 + $0x28] sm:$0xff]   ;;  %v106_v58 = vld [vmem:[%s1614_s0 + $0x18] sm:$0xff]  ;;  %v1436_v59 = vld [vmem:[%s1617_s3 + $0x30] sm:$0xff]  }
  0x18   :  { %857 = vmatpush3.bf16.msra.mxu0 %v1367_v51  ;;  %v105_v47 = vld [vmem:[%s1614_s0 + $0x10] sm:$0xff]  ;;  %v1451_v38 = vld [vmem:[%s1617_s3 + $0x38] sm:$0xff]  }
  0x19   :  { %858 = vmatprep.subr.bf16.mxu0 %v1373_v52  ;;  %979 = vpow2.f32 %v786_v61  ;;  %v1442_v61 = vld [vmem:[%s1617_s3 + $0x78] sm:$0xff]   ;;  %1649 = vst [vmem:[#allocation27_spill] sm:$0xff] %v1451_v38  ;;  %s1065_s3 = smov 126  }
  0x1a   :  { %981 = vpow2.f32 %v787_v62  ;;  %1648 = vst [vmem:[#allocation26_spill] sm:$0xff] %v1442_v61  ;;  %v788_v62 = vmul.f32 -1.442695, %v106_v58 }
  0x1c   :  { %859 = vmatpush3.bf16.msra.mxu0 %v1379_v53  ;;  %983 = vpow2.f32 %v788_v62 }
  0x1d   :  { %860 = vmatprep.subr.bf16.mxu0 %v1385_v54  ;;  %985 = vtanh.f32 %v105_v47 }
  0x20   :  { %861 = vmatpush3.bf16.msra.mxu0 %v1391_v55 }
  0x21   :  { %862 = vmatprep.subr.bf16.mxu0 %v1397_v56 }
  0x23   :  { %v980_v41 = vpop.eup %979 }
  0x24   :  { %863 = vmatpush3.bf16.msra.mxu0 %v1403_v57  ;;  %v982_v32 = vpop.eup %981  ;;  %v110_v35 = vadd.f32 1.0, %v980_v41 }
  0x25   :  { %864 = vmatprep.subr.bf16.mxu0 %v1415_v60  ;;  %v116_v26 = vadd.f32 1.0, %v982_v32 }
  0x26   :  { %987 = vrcp.f32 %v110_v35  ;;  %v984_v58 = vpop.eup %983 }
  0x27   :  { %989 = vrcp.f32 %v116_v26  ;;  %v986_v29 = vpop.eup %985  ;;  %v123_v23 = vadd.f32 1.0, %v984_v58 }
  0x28   :  { %865 = vmatpush3.bf16.msra.mxu0 %v1421_v63 }
  0x29   :  { %866 = vmatprep.subr.bf16.mxu0 %v1427_v44  ;;  %991 = vrcp.f32 %v123_v23 }
  0x2c   :  { %867 = vmatpush3.bf16.msra.mxu0 %v1436_v59 }
  0x2d   :  { %868 = vmatprep.subr.bf16.mxu0 %v1442_v61 }
  0x30   :  { %869 = vmatpush3.bf16.msra.mxu0 %v1451_v38  ;;  %v988_v20 = vpop.eup %987 }
  0x31   :  { %v990_v14 = vpop.eup %989  ;;  %v127_v17 = vmul.f32 %v988_v20, %v986_v29 }
  0x32   :  { %v126_v8 = vmul.f32 0.0, %v990_v14 }
  0x33   :  { %v992_v62 = vpop.eup %991 }
  0x34   :  { %v128_v11 = vadd.f32 %v127_v17, %v126_v8  }
  0x36   :  { %993 = vtanh.f32 %v128_v11  ;;  %v132_v2 = vpack.c.bf16 %v128_v11, %v128_v11 }
  0x38   :  { %261 = vmatprep.mubr.bf16.mxu0 %v132_v2  ;;  %v1458_v2 = vld [vmem:[%s1618_s4] ss:$0 sm:$0xff] }
  0x40   :  { %v994_v41 = vpop.eup %993 }
  0x41   :  { %v130_v47 = vmul.f32 %v994_v41, %v992_v62  }
  0x43   :  { %v131_v32 = vpack.c.bf16 %v130_v47, %v130_v47 }
  0x45   :  { %262 = vmatmul.mubr.bf16.vlgmr.msra.gmra.mrb[0].mxu0 %v131_v32 }
 0x118   :  { %v870_v5 = vpop.f32.mrb[0].mxu0 }
 0x119   :  { %v871_v35 = vpop.f32.mrb[1].mxu0 }
 0x11a   :  { %v872_v26 = vadd.f32 %v871_v35, %v870_v5  ;;  %v873_v38 = vpop.f32.mrb[2].mxu0 }
 0x11b   :  { %v874_v61 = vpop.f32.mrb[3].mxu0 }
 0x11c   :  { %270 = vrot.lane.b32.xlu0 %v872_v26, %s1065_s3 }
 0x120   :  { %273 = vrot.lane.b32.xlu0 %v872_v26, %s1066_s27 }
 0x18e   :  { %v271_v14 = vpop.permute.xlu0 %270 }
 0x192   :  { %v274_v8 = vpop.permute.xlu0 %273 }
 0x193   :  { %v277_v17 = vsel %vm276_vm0, %v271_v14, %v274_v8 }
 0x194   :  { %v279_v5 = vsel %vm278_vm1, %v277_v17, %v872_v26 }
 0x195   :  { %v281_v20 = vsel %vm280_vm2, %v279_v5, 0.0 }
 0x196   :  { %v288_v23 = vadd.f32 %v1458_v2, %v281_v20 }
 0x198   :  { %289 = vst [vmem:[#allocation2] sm:$0xff] %v288_v23 }
 0x199 LB: > { %v1650_v6 = vld [vmem:[#allocation11_spill] sm:$0xff]  ;;  %v1651_v4 = vld [vmem:[#allocation9_spill] sm:$0xff]  ;;  %v1652_v3 = vld [vmem:[#allocation8_spill] sm:$0xff]  ;;  %v814_v41 = vcombine.high %v1145_v7, %v1160_v10  ;;  %v817_v35 = vcombine.high %v1170_v12, %v1185_v15  ;;  %v813_v26 = vcombine.low %v1145_v7, %v1160_v10  ;;  %v819_v14 = vcombine.high %v1175_v13, %v1190_v16  ;;  %s853_s4 = sshll.u32 %s1063_s30, 5  ;;  %s851_s9 = sshll.u32 %s1063_s30, 3  ;;  %v1059_v47 = vphi %v130_v47, %v735_v47   ;;  %v1055_v11 = vphi %v128_v11, %v661_v11   ;;  %s1063_s30 = sphi %s1468_s30, %s295_s30  }
 0x19a   : > { %v1653_v1 = vld [vmem:[#allocation6_spill] sm:$0xff]  ;;  %v1654_v0 = vld [vmem:[#allocation5_spill] sm:$0xff]  ;;  %v812_v61 = vcombine.high %v1650_v6, %v1155_v9  ;;  %v811_v32 = vcombine.low %v1650_v6, %v1155_v9  ;;  %v1067_v8 = vmov 0   ;;  %v816_v17 = vcombine.low %v1170_v12, %v1185_v15  ;;  %s631_s8 = scalar_lea.vmem %s1614_s0, %s853_s4  ;;  %s707_s12 = scalar_lea.vmem %s1615_s1, %s851_s9 }
 0x19b   : > { %v807_v29 = vcombine.high %v1654_v0, %v1652_v3  ;;  %v806_v38 = vcombine.low %v1654_v0, %v1652_v3  ;;  %v809_v58 = vcombine.high %v1653_v1, %v1651_v4  ;;  %v808_v62 = vcombine.low %v1653_v1, %v1651_v4  ;;  %539 = vmatprep.mubr.bf16.mxu0 %v1067_v8  ;;  %v634_v1 = vld [vmem:[%s631_s8 + $0x10] sm:$0xff]  ;;  %s1070_s13 = smov 1   ;;  %s1072_s14 = smov 126  }
 0x19c   : > { %580 = vmatprep.mubr.bf16.mxu1 %v1067_v8  ;;  %v822_v5 = vcombine.high %v1200_v18, %v1215_v21  ;;  %v818_v20 = vcombine.low %v1175_v13, %v1190_v16  ;;  %v824_v23 = vcombine.high %v1205_v19, %v1220_v22  ;;  %v833_v8 = vcombine.low %v1265_v31, %v1280_v34  ;;  %s1073_s15 = smov 125   ;;  %s751_s16 = scalar_lea.vmem [#allocation2], %s851_s9 }
 0x19d   : > { %507 = vmatprep.subr.bf16.mxu0 %v807_v29  ;;  %548 = vmatprep.subr.bf16.mxu1 %v809_v58  ;;  %v821_v29 = vcombine.low %v1200_v18, %v1215_v21  ;;  %v829_v58 = vcombine.high %v1235_v25, %v1250_v28  ;;  %vm1069_vm3 = vmmov 0   ;;  %s295_s30 = sadd.s32 1, %s1063_s30  }
 0x19e   : > { %508 = vmatpush1.bf16.msra.mxu0 %v806_v38  ;;  %549 = vmatpush1.bf16.msra.mxu1 %v808_v62  ;;  %v827_v38 = vcombine.high %v1230_v24, %v1245_v27  ;;  %v826_v62 = vcombine.low %v1230_v24, %v1245_v27  ;;  %p292_p0 = scmp.ge.s32.totalorder %s295_s30, 8  }
 0x19f   : > { %509 = vmatprep.subr.bf16.mxu0 %v812_v61  ;;  %550 = vmatprep.subr.bf16.mxu1 %v814_v41  ;;  %v823_v61 = vcombine.low %v1205_v19, %v1220_v22  ;;  %v832_v41 = vcombine.high %v1260_v30, %v1275_v33  ;;  %s1074_s17 = smov (%p292_p0), [#allocation2]  }
 0x1a0   :  { %s758_s18 = sshll.u32 (%p292_p0), %s1074_s17, 4  ;;  %s759_s18 = int_to_ptr.vmem [resolvable:$true] %s758_s18 }
 0x1a1   :  { %s1017_s19 = scalar_lea.vmem (%p292_p0), %s759_s18, 1024  ;;  %p1022_p2 = scmp.lt.s32.totalorder (%p292_p0), %s759_s18, %s759_s18 }
 0x1a2   : > { %510 = vmatpush1.bf16.msra.mxu0 %v811_v32  ;;  %551 = vmatpush1.bf16.msra.mxu1 %v813_v26  ;;  %v828_v32 = vcombine.low %v1235_v25, %v1250_v28  ;;  %v831_v26 = vcombine.low %v1260_v30, %v1275_v33  ;;  %p1018_p1 = scmp.ne.s32.totalorder (%p292_p0), %s759_s18, %s1017_s19  ;;  %p1023_p3 = scmp.lt.s32.totalorder (%p292_p0), %s1017_s19, %s1017_s19 }
 0x1a3   : > { %511 = vmatprep.subr.bf16.mxu0 %v817_v35  ;;  %552 = vmatprep.subr.bf16.mxu1 %v819_v14  ;;  %v834_v35 = vcombine.high %v1265_v31, %v1280_v34  ;;  %v837_v14 = vcombine.high %v1290_v36, %v1305_v39 }
 0x1a4   :  { %p1024_p4 = por (%p292_p0), %p1023_p3, %p1022_p2 }
 0x1a6   : > { %512 = vmatpush1.bf16.msra.mxu0 %v816_v17  ;;  %553 = vmatpush1.bf16.msra.mxu1 %v818_v20  ;;  %v839_v17 = vcombine.high %v1295_v37, %v1310_v40  ;;  %v842_v20 = vcombine.high %v1320_v42, %v1335_v45  ;;  %p1025_p5 = pnand (%p292_p0), %p1024_p4, %p1018_p1 }
 0x1a7   : > { %513 = vmatprep.subr.bf16.mxu0 %v822_v5  ;;  %554 = vmatprep.subr.bf16.mxu1 %v824_v23  ;;  %v836_v5 = vcombine.low %v1290_v36, %v1305_v39  ;;  %v838_v23 = vcombine.low %v1295_v37, %v1310_v40 }
 0x1aa   : > { %514 = vmatpush1.bf16.msra.mxu0 %v821_v29  ;;  %555 = vmatpush1.bf16.msra.mxu1 %v823_v61  ;;  %v844_v29 = vcombine.high %v1325_v43, %v1340_v46  ;;  %v843_v61 = vcombine.low %v1325_v43, %v1340_v46 }
 0x1ab   : > { %515 = vmatprep.subr.bf16.mxu0 %v827_v38  ;;  %556 = vmatprep.subr.bf16.mxu1 %v829_v58  ;;  %v841_v38 = vcombine.low %v1320_v42, %v1335_v45  ;;  %v298_v58 = vpack.c.bf16 %v1059_v47, %v1059_v47 }
 0x1ae   : > { %516 = vmatpush1.bf16.msra.mxu0 %v826_v62  ;;  %557 = vmatpush1.bf16.msra.mxu1 %v828_v32  ;;  %v1655_v62 = vld [vmem:[#allocation26_spill] sm:$0xff] }
 0x1af   : > { %517 = vmatprep.subr.bf16.mxu0 %v832_v41  ;;  %558 = vmatprep.subr.bf16.mxu1 %v834_v35  ;;  %v1656_v41 = vld [vmem:[#allocation27_spill] sm:$0xff]  ;;  %v1657_v32 = vld [vmem:[#allocation10_spill] sm:$0xff] }
 0x1b0   : > { %v1658_v35 = vld [vmem:[#allocation7_spill] sm:$0xff] }
 0x1b2   : > { %518 = vmatpush1.bf16.msra.mxu0 %v831_v26  ;;  %559 = vmatpush1.bf16.msra.mxu1 %v833_v8  ;;  %v810_v26 = vcombine.low %v1658_v35, %v1657_v32  ;;  %v1659_v8 = vld [vmem:[#allocation13_spill] sm:$0xff]  ;;  %v1666_v32 = vld [vmem:[#allocation18_spill] sm:$0xff] }
 0x1b3   : > { %519 = vmatprep.subr.bf16.mxu0 %v837_v14  ;;  %560 = vmatprep.subr.bf16.mxu1 %v839_v17  ;;  %v1068_v14 = vmov 0.0   ;;  %v1660_v17 = vld [vmem:[#allocation12_spill] sm:$0xff] }
 0x1b6   : > { %520 = vmatpush1.bf16.msra.mxu0 %v836_v5  ;;  %561 = vmatpush1.bf16.msra.mxu1 %v838_v23  ;;  %v815_v5 = vcombine.low %v1660_v17, %v1659_v8  ;;  %v1662_v23 = vld [vmem:[#allocation14_spill] sm:$0xff]  ;;  %v1668_v8 = vld [vmem:[#allocation20_spill] sm:$0xff] }
 0x1b7   : > { %521 = vmatprep.subr.bf16.mxu0 %v842_v20  ;;  %562 = vmatprep.subr.bf16.mxu1 %v844_v29  ;;  %v1661_v20 = vld [vmem:[#allocation15_spill] sm:$0xff] }
 0x1b8   : > { %v820_v29 = vcombine.low %v1662_v23, %v1661_v20  ;;  %v1670_v20 = vld [vmem:[#allocation22_spill] sm:$0xff] }
 0x1ba   : > { %522 = vmatpush1.bf16.msra.mxu0 %v841_v38  ;;  %563 = vmatpush1.bf16.msra.mxu1 %v843_v61  ;;  %v1663_v38 = vld [vmem:[#allocation17_spill] sm:$0xff]  ;;  %v1664_v61 = vld [vmem:[#allocation16_spill] sm:$0xff] }
 0x1bb   : > { %885 = vmatprep.subr.bf16.mxu1 %v1350_v48  ;;  %907 = vmatprep.subr.bf16.mxu0 %v1068_v14 }
 0x1bd   : > { %540 = vmatmul.mubr.bf16.vlgmr.msra.gmra.mrb[0].mxu0 %v298_v58  ;;  %581 = vmatmul.mubr.bf16.vlgmr.msra.gmra.mrb[0].mxu1 %v298_v58 }
 0x1be   : > { %886 = vmatpush3.bf16.msra.mxu1 %v1355_v49  ;;  %908 = vmatpush3.bf16.msra.mxu0 %v810_v26  ;;  %v1667_v26 = vld [vmem:[#allocation21_spill] sm:$0xff] }
 0x1bf   : > { %887 = vmatprep.subr.bf16.mxu1 %v1361_v50  ;;  %909 = vmatprep.subr.bf16.mxu0 %v1068_v14  ;;  %v835_v17 = vcombine.low %v1668_v8, %v1667_v26 }
 0x1c0   : > { %923 = vmatprep.mubr.msk.bf16.mxu0 %vm1069_vm3, %v1068_v14 }
 0x1c2   : > { %888 = vmatpush3.bf16.msra.mxu1 %v1367_v51  ;;  %910 = vmatpush3.bf16.msra.mxu0 %v815_v5  ;;  %v1669_v5 = vld [vmem:[#allocation23_spill] sm:$0xff] }
 0x1c3   : > { %889 = vmatprep.subr.bf16.mxu1 %v1373_v52  ;;  %911 = vmatprep.subr.bf16.mxu0 %v1068_v14  ;;  %v840_v23 = vcombine.low %v1670_v20, %v1669_v5 }
 0x1c6   : > { %890 = vmatpush3.bf16.msra.mxu1 %v1379_v53  ;;  %912 = vmatpush3.bf16.msra.mxu0 %v820_v29  ;;  %v1671_v29 = vld [vmem:[#allocation25_spill] sm:$0xff] }
 0x1c7   : > { %891 = vmatprep.subr.bf16.mxu1 %v1385_v54  ;;  %913 = vmatprep.subr.bf16.mxu0 %v1068_v14 }
 0x1ca   : > { %892 = vmatpush3.bf16.msra.mxu1 %v1391_v55 }
 0x1cb   : > { %893 = vmatprep.subr.bf16.mxu1 %v1397_v56 }
 0x1ce   : > { %894 = vmatpush3.bf16.msra.mxu1 %v1403_v57 }
 0x1cf   : > { %895 = vmatprep.subr.bf16.mxu1 %v1415_v60 }
 0x1d2   : > { %896 = vmatpush3.bf16.msra.mxu1 %v1421_v63 }
 0x1d3   : > { %897 = vmatprep.subr.bf16.mxu1 %v1427_v44 }
 0x1d6   : > { %898 = vmatpush3.bf16.msra.mxu1 %v1436_v59 }
 0x1d7   : > { %899 = vmatprep.subr.bf16.mxu1 %v1655_v62  ;;  %v825_v62 = vcombine.low %v1664_v61, %v1663_v38  ;;  %v1672_v38 = vld [vmem:[#allocation24_spill] sm:$0xff] }
 0x1d8   : > { %v845_v61 = vcombine.low %v1672_v38, %v1671_v29  ;;  %v635_v38 = vld [vmem:[%s631_s8 + $0x18] sm:$0xff] }
 0x1d9   : > { %914 = vmatpush3.bf16.msra.mxu0 %v825_v62  ;;  %v632_v62 = vld [vmem:[%s631_s8] sm:$0xff] }
 0x1da   : > { %900 = vmatpush3.bf16.msra.mxu1 %v1656_v41  ;;  %v1665_v41 = vld [vmem:[#allocation19_spill] sm:$0xff]  ;;  %915 = vmatprep.subr.bf16.mxu0 %v1068_v14 }
 0x1db   : > { %v830_v35 = vcombine.low %v1666_v32, %v1665_v41  ;;  %v633_v41 = vld [vmem:[%s631_s8 + $0x8] sm:$0xff] }
 0x1dd   : > { %916 = vmatpush3.bf16.msra.mxu0 %v830_v35 }
 0x1de   : > { %917 = vmatprep.subr.bf16.mxu0 %v1068_v14 }
 0x1e1   : > { %918 = vmatpush3.bf16.msra.mxu0 %v835_v17 }
 0x1e2   : > { %919 = vmatprep.subr.bf16.mxu0 %v1068_v14 }
 0x1e5   : > { %920 = vmatpush3.bf16.msra.mxu0 %v840_v23 }
 0x1e6   : > { %921 = vmatprep.subr.bf16.mxu0 %v1068_v14 }
 0x1e9   : > { %922 = vmatpush3.bf16.msra.mxu0 %v845_v61 }
 0x1ec   : > { %924 = vmatmul.mubr.bf16.vlgmr.msra.gmra.mrb[4].mxu0 %v298_v58 }
 0x290   : > { %v541_v32 = vpop.f32.mrb[0].mxu0  ;;  %v582_v8 = vpop.f32.mrb[0].mxu1 }
 0x291   : > { %v636_v35 = vadd.f32 %v632_v62, %v541_v32  ;;  %v543_v26 = vpop.f32.mrb[1].mxu0  ;;  %v584_v20 = vpop.f32.mrb[1].mxu1  ;;  %v638_v4 = vadd.f32 %v634_v1, %v582_v8 }
 0x292   : > { %v637_v17 = vadd.f32 %v633_v41, %v543_v26  ;;  %v545_v5 = vpop.f32.mrb[2].mxu0  ;;  %v586_v29 = vpop.f32.mrb[2].mxu1  ;;  %v639_v61 = vadd.f32 %v635_v38, %v584_v20 }
 0x293   : > { %v848_v23 = vmul.f32 -1.442695, %v636_v35  ;;  %v546_v0 = vpop.f32.mrb[3].mxu0  ;;  %v587_v58 = vpop.f32.mrb[3].mxu1 }
 0x294   : > { %v849_v14 = vmul.f32 -1.442695, %v637_v17  ;;  %v850_v3 = vmul.f32 -1.442695, %v639_v61 }
 0x295   : > { %997 = vpow2.f32 %v848_v23 }
 0x296   : > { %999 = vpow2.f32 %v849_v14 }
 0x297   : > { %1001 = vpow2.f32 %v850_v3 }
 0x298   : > { %1003 = vtanh.f32 %v638_v4 }
 0x29f   : > { %v998_v6 = vpop.eup %997 }
 0x2a0   : > { %v1000_v62 = vpop.eup %999  ;;  %v643_v32 = vadd.f32 1.0, %v998_v6 }
 0x2a1   : > { %v649_v41 = vadd.f32 1.0, %v1000_v62  ;;  %v1002_v35 = vpop.eup %1001 }
 0x2a2   : > { %1005 = vrcp.f32 %v643_v32  ;;  %v1004_v0 = vpop.eup %1003  ;;  %v656_v17 = vadd.f32 1.0, %v1002_v35 }
 0x2a3   : > { %1007 = vrcp.f32 %v649_v41 }
 0x2a4   : > { %1009 = vrcp.f32 %v656_v17 }
 0x2ac   : > { %v1006_v26 = vpop.eup %1005 }
 0x2ad   : > { %v1008_v5 = vpop.eup %1007  ;;  %v660_v29 = vmul.f32 %v1006_v26, %v1004_v0  ;;  %v708_v0 = vld [vmem:[%s707_s12] sm:$0xff] }
 0x2ae   : > { %v659_v20 = vmul.f32 %v1055_v11, %v1008_v5  ;;  %v1010_v3 = vpop.eup %1009  ;;  %v1071_v5 = vmov 1  }
 0x2af   : > { %996 = vset.pattern.permute.xlu1 %v1071_v5  ;;  %995 = vset.pattern.permute.xlu0 %v1071_v5 }
 0x2b0   : > { %v661_v11 = vadd.f32 %v660_v29, %v659_v20  }
 0x2b2   : > { %1011 = vtanh.f32 %v661_v11  ;;  %v665_v1 = vpack.c.bf16 %v661_v11, %v661_v11 }
 0x2b4   : > { %698 = vmatprep.mubr.bf16.mxu1 %v665_v1 }
 0x2bc   : > { %v1012_v4 = vpop.eup %1011 }
 0x2bd   : > { %v663_v6 = vmul.f32 %v1012_v4, %v1010_v3 }
 0x2bf   : > { %v664_v8 = vpack.c.bf16 %v663_v6, %v663_v6  ;;  %v623_v23 = vpop.f32.mrb[4].mxu0 }
 0x2c0   : > { %v925_v14 = vpop.f32.mrb[5].mxu0 }
 0x2c1   : > { %699 = vmatmul.mubr.bf16.vlgmr.msra.gmra.mrb[4].mxu1 %v664_v8  ;;  %v626_v38 = vpop.f32.mrb[6].mxu0 }
 0x2c2   : > { %v926_v58 = vpop.f32.mrb[7].mxu0 }
 0x394   : > { %v901_v61 = vpop.f32.mrb[4].mxu1 }
 0x395   : > { %v902_v62 = vpop.f32.mrb[5].mxu1 }
 0x396   : > { %v903_v32 = vadd.f32 %v902_v62, %v901_v61  ;;  %v904_v41 = vpop.f32.mrb[6].mxu1 }
 0x397   : > { %v905_v35 = vpop.f32.mrb[7].mxu1 }
 0x398   : > { %v709_v26 = vsub.f32 %v903_v32, %v623_v23 }
 0x39a   : > { %v710_v17 = vadd.f32 %v709_v26, %v708_v0 }
 0x39c   : > { %712 = vrot.lane.b32.xlu0 %v710_v17, %s1070_s13 }
 0x40e   : > { %v713_v29 = vpop.permute.xlu0 %712 }
 0x40f   : > { %v715_v20 = vsub.f32 %v710_v17, %v713_v29 }
 0x411   : > { %v852_v1 = vmul.f32 -1.442695, %v715_v20 }
 0x413   : > { %1013 = vpow2.f32 %v852_v1 }
 0x41d   : > { %v1014_v3 = vpop.eup %1013 }
 0x41e   : > { %v719_v4 = vadd.f32 1.0, %v1014_v3 }
 0x420   : > { %1015 = vrcp.f32 %v719_v4 }
 0x42a   : > { %v1016_v8 = vpop.eup %1015 }
 0x42b   : > { %731 = vperm.xlu1 %996, %v1016_v8   ;;  %v722_v14 = vsub.f32 1.0, %v1016_v8 }
 0x42d   : > { %725 = vperm.xlu0 %995, %v722_v14  }
 0x4aa   : > { %v732_v38 = vpop.permute.xlu1 %731 }
 0x4ab   : > { %v734_v61 = vmul.f32 %v732_v38, %v663_v6  ;;  %v737_v62 = vmul.f32 %v903_v32, %v732_v38 }
 0x4ac   : > { %v726_v58 = vpop.permute.xlu0 %725 }
 0x4ad   : > { %v728_v41 = vmul.f32 %v1059_v47, %v726_v58  ;;  %v736_v35 = vmul.f32 %v726_v58, %v623_v23 }
 0x4af   : > { %v735_v47 = vadd.f32 %v734_v61, %v728_v41   ;;  %v738_v0 = vadd.f32 %v737_v62, %v736_v35 }
 0x4b1   : > { %740 = vrot.lane.b32.xlu1 %v738_v0, %s1072_s14 }
 0x4b5   : > { %744 = vrot.lane.b32.xlu1 %v903_v32, %s1073_s15 }
 0x523   : > { %v741_v26 = vpop.permute.xlu1 %740 }
 0x527   : > { %v745_v17 = vpop.permute.xlu1 %744  ;;  %294 = sbr.rel (!%p292_p0) target bundleno = 409 (0x199), region = 50 }
 0x528   : > { %v747_v5 = vsel %vm276_vm0, %v741_v26, %v745_v17 }
 0x529   : > { %v748_v29 = vsel %vm278_vm1, %v747_v5, %v738_v0 }
 0x52a   : > { %v749_v20 = vsel %vm280_vm2, %v748_v29, 0.0 }
 0x52b   : > { %v750_v6 = vadd.f32 %v1458_v2, %v749_v20 }
 0x52d   : > { %752 = vst [vmem:[%s751_s16] sm:$0xff] %v750_v6 }
 0x52e   :  { %1028 = shalt.err (!%p1025_p5)
}
 0x52f   :  { %s1029_s21 = scalar_lea.hbm %s1619_s5, 1024 }
 0x530   :  { %p1030_p6 = scmp.ne.s32.totalorder %s1619_s5, %s1029_s21  ;;  %p1033_p7 = scmp.lt.u32.totalorder %s1029_s21, %s1619_s5 }
 0x532   :  { %p1035_p8 = pnand %p1033_p7, %p1030_p6 }
 0x534   :  { %1038 = shalt.err (!%p1035_p8)
}
 0x535   :  { %s1075_s0 = smov 128   ;;  %s1076_s1 = smov 8  }
 0x536   :  { %764 = dma.vmem_to_hbm [thread:$0]  %s759_s18, 1024, %s1619_s5, [#allocation3], %s1075_s0, %s1075_s0, %s1076_s1  }
 0x537   :  { %1051 = dma.done.wait [#allocation3], 1024  }
 0x538   :  { %1052 = vsyncadd [#allocation3], 4294966272 }
 0x539   :  { %768 = vsyncpa [#allocation3], 1 }

</bundles_post_ra>
